<compile_context>
chip_gen: v7x
topology: tpu7x:2x2x1
jax: 0.10.0
libtpu: 0.0.40
codegen_flags: <defaults>
</compile_context>

<pallas_src>
import numpy as np
import jax
import jax.numpy as jnp
from jax.experimental import pallas as pl
from jax.experimental.pallas import tpu as pltpu

_LANES = 128
_SUBLANES = 8


def _round_up(a, b):
    return -(-a // b) * b


def _fourier_kernel(x_ref, b_ref, phase_ref, o_ref):
    # MXU matmul (f32 accumulate) + one EUP sin over the whole lane-dense tile.
    proj = jnp.dot(x_ref[...], b_ref[...], preferred_element_type=jnp.float32)
    o_ref[...] = jnp.sin(proj + phase_ref[...]).astype(o_ref.dtype)


def _choose_tile(packed_rows, kd, n, budget_bytes=12 * 1024 * 1024):
    """Largest packed-row tile (<=1024, multiple of 8) whose double-buffered
    x/out tiles + resident B/phase fit comfortably in scoped VMEM on all chips."""
    fixed = 2 * 4 * (kd * n + n)      # B_blk + phase, f32, double-buffered
    per_row = 2 * 4 * (kd + n)        # x + out per packed row, f32, double-buffered
    tile = 1024
    while tile > _SUBLANES and fixed + tile * per_row > budget_bytes:
        tile //= 2
    return max(_SUBLANES, min(tile, _round_up(packed_rows, _SUBLANES)))


def fourier_embedding(x2d, b_blk, phase, r, out_dtype=None):
    """x2d: (M, D) f32; b_blk: (r*D, r*2H) frozen (2*pi*scale folded in);
    phase: (1, r*2H). Returns (M, 2H) = [sin(2*pi*x@B), cos(2*pi*x@B)]."""
    M, D = x2d.shape
    kd, n = b_blk.shape
    assert kd == r * D
    h2 = n // r
    out_dtype = out_dtype or x2d.dtype

    # --- plan tiling / padding (all wrapper-side layout plumbing) ---
    packed_rows = pl.cdiv(M, r)
    tile = _choose_tile(packed_rows, kd, n)
    packed_rows_pad = _round_up(packed_rows, tile)
    m_pad = packed_rows_pad * r
    if m_pad != M:
        x2d = jnp.pad(x2d, ((0, m_pad - M), (0, 0)))
    x_packed = x2d.reshape(packed_rows_pad, kd)      # free: same row-major bytes

    grid = (packed_rows_pad // tile,)
    out_packed = pl.pallas_call(
        _fourier_kernel,
        out_shape=jax.ShapeDtypeStruct((packed_rows_pad, n), out_dtype),
        grid_spec=pltpu.PrefetchScalarGridSpec(
            num_scalar_prefetch=0,
            grid=grid,
            in_specs=[
                pl.BlockSpec((tile, kd), lambda i: (i, 0)),   # row tile of packed x
                pl.BlockSpec((kd, n), lambda i: (0, 0)),      # whole B_blk, resident
                pl.BlockSpec((1, n), lambda i: (0, 0)),       # phase row, resident
            ],
            out_specs=pl.BlockSpec((tile, n), lambda i: (i, 0)),
        ),
        compiler_params=pltpu.CompilerParams(
            dimension_semantics=("parallel",),
        ),
        cost_estimate=pl.CostEstimate(
            flops=2 * packed_rows_pad * kd * n,
            transcendentals=packed_rows_pad * n,
            bytes_accessed=4 * (packed_rows_pad * kd + kd * n + n
                                + packed_rows_pad * n),
        ),
    )(x_packed, b_blk, phase)

    out = out_packed.reshape(m_pad, h2)              # free: same row-major bytes
    if m_pad != M:
        out = out[:M]
    return out


class FourierEmbeddingJax:
    """Mirror of the PyTorch module; B is a frozen deterministic parameter."""

    def __init__(self, input_dims, embed_dims, scale=1.0, key=None):
        assert embed_dims % 2 == 0
        self.input_dims = input_dims
        self.embed_dims = embed_dims
        self.scale = scale
        if key is None:
            key = jax.random.PRNGKey(42)
        h = embed_dims // 2
        # Frozen parameter, mirrors torch: B = scale * randn(D, H)
        self.B = scale * jax.random.normal(key, (input_dims, h), dtype=jnp.float32)

        # --- one-time parameter transforms for the kernel ---
        h2 = 2 * h
        self.r = (_LANES // h2) if (h2 < _LANES and _LANES % h2 == 0) else 1
        b_eff = (2.0 * np.pi) * self.B                       # fold 2*pi (+scale) once
        b_cat = jnp.concatenate([b_eff, b_eff], axis=1)      # (D, 2H): sin half | cos half
        # Block-diagonal so r packed input rows map to r lane-dense output groups.
        self.B_blk = jnp.kron(jnp.eye(self.r, dtype=jnp.float32), b_cat)  # (r*D, r*2H)
        # Additive phase: 0 on the sin half, pi/2 on the cos half (cos t = sin(t+pi/2)).
        phase = jnp.concatenate(
            [jnp.zeros((h,), jnp.float32),
             jnp.full((h,), np.pi / 2.0, jnp.float32)])
        self.phase = jnp.tile(phase, (self.r,)).reshape(1, self.r * h2)

    def __call__(self, x):
        lead = x.shape[:-1]
        x2d = x.reshape((-1, self.input_dims)).astype(jnp.float32)
        out = fourier_embedding(x2d, self.B_blk, self.phase, self.r)
        return out.reshape(lead + (self.embed_dims,))


if __name__ == "__main__":
    key = jax.random.PRNGKey(0)
    kx, kb = jax.random.split(key)

    input_dims = 4
    embed_dims = 32
    batch, seq = 2, 8

    module = FourierEmbeddingJax(input_dims, embed_dims, scale=1.0, key=kb)
    x = jax.random.normal(kx, (batch, seq, input_dims), dtype=jnp.float32)

    out = module(x)
    out = jax.block_until_ready(out)

    # Independent numpy reference of the PyTorch math (f64 host matmul).
    xb = np.asarray(x, dtype=np.float64) @ np.asarray(module.B, dtype=np.float64)
    proj_ref = 2.0 * np.pi * xb
    ref = np.concatenate([np.sin(proj_ref), np.cos(proj_ref)], axis=-1).astype(np.float32)
    np.testing.assert_allclose(np.asarray(out), ref, rtol=1e-4, atol=1e-4)

    assert out.shape == (batch, seq, embed_dims)
    print("KERNEL_OK")
</pallas_src>

<mosaic_0001>
module attributes {stable_mosaic.version = 11 : i64} {
  func.func @_fourier_kernel(%arg0: i32, %arg1: memref<8x16xf32, #tpu.memory_space<vmem>>, %arg2: memref<16x128xf32, #tpu.memory_space<vmem>>, %arg3: memref<1x128xf32, #tpu.memory_space<vmem>>, %arg4: memref<8x128xf32, #tpu.memory_space<vmem>>) attributes {dimension_semantics = [#tpu.dimension_semantics<parallel>], iteration_bounds = array<i64: 1>, scalar_prefetch = 0 : i64, scratch_operands = 0 : i64, tpu.core_type = #tpu.core_type<tc>, window_params = [{transform_indices = @transform_0, window_bounds = array<i64: 8, 16>}, {pipeline_mode = #tpu.pipeline_mode<synchronous>, transform_indices = @transform_1, window_bounds = array<i64: 16, 128>}, {pipeline_mode = #tpu.pipeline_mode<synchronous>, transform_indices = @transform_2, window_bounds = array<i64: 1, 128>}, {transform_indices = @transform_3, window_bounds = array<i64: 8, 128>}]} {
    %c0 = arith.constant 0 : index
    %c0_0 = arith.constant 0 : index
    %0 = vector.load %arg1[%c0, %c0_0] : memref<8x16xf32, #tpu.memory_space<vmem>>, vector<8x16xf32>
    %c0_1 = arith.constant 0 : index
    %c0_2 = arith.constant 0 : index
    %1 = vector.load %arg2[%c0_1, %c0_2] : memref<16x128xf32, #tpu.memory_space<vmem>>, vector<16x128xf32>
    %cst = arith.constant dense<0.000000e+00> : vector<8x128xf32>
    %2 = tpu.matmul %0, %1, %cst {dimension_numbers = #tpu.dot_dimension_numbers<[1], [0], [0], [1], [0, 0, 1, 1], [], []>} : vector<8x16xf32>, vector<16x128xf32>, vector<8x128xf32> -> vector<8x128xf32>
    %c0_3 = arith.constant 0 : index
    %c0_4 = arith.constant 0 : index
    %3 = vector.load %arg3[%c0_3, %c0_4] : memref<1x128xf32, #tpu.memory_space<vmem>>, vector<1x128xf32>
    %4 = vector.broadcast %3 : vector<1x128xf32> to vector<8x128xf32>
    %5 = arith.addf %2, %4 : vector<8x128xf32>
    %6 = math.sin %5 : vector<8x128xf32>
    %c0_5 = arith.constant 0 : index
    %c0_6 = arith.constant 0 : index
    %7 = vector.load %arg4[%c0_5, %c0_6] : memref<8x128xf32, #tpu.memory_space<vmem>>, vector<8x128xf32>
    tpu.vector_store %arg4[%c0_5, %c0_6], %6 {strides = array<i32>} : memref<8x128xf32, #tpu.memory_space<vmem>>, vector<8x128xf32>,
    return
  }
  func.func @transform_0(%arg0: i32) -> (i32, i32) {
    %c0_i32 = arith.constant 0 : i32
    %c0_i32_0 = arith.constant 0 : i32
    return %arg0, %c0_i32 : i32, i32
  }
  func.func @transform_1(%arg0: i32) -> (i32, i32) {
    %c0_i32 = arith.constant 0 : i32
    %c0_i32_0 = arith.constant 0 : i32
    %c0_i32_1 = arith.constant 0 : i32
    return %c0_i32, %c0_i32_0 : i32, i32
  }
  func.func @transform_2(%arg0: i32) -> (i32, i32) {
    %c0_i32 = arith.constant 0 : i32
    %c0_i32_0 = arith.constant 0 : i32
    %c0_i32_1 = arith.constant 0 : i32
    return %c0_i32, %c0_i32_0 : i32, i32
  }
  func.func @transform_3(%arg0: i32) -> (i32, i32) {
    %c0_i32 = arith.constant 0 : i32
    %c0_i32_0 = arith.constant 0 : i32
    return %arg0, %c0_i32 : i32, i32
  }
}

</mosaic_0001>

<bundles_post_ra>
// kernel: tpu_custom_call.1
= control target key start
LH: loop header
LB: loop body
LE: loop exit
PB: predicated region body
PF: predicated region fallthrough
CT: control target
= control target key end

     0   :  { %8 = vsyncpa [#allocation3], 0  ;;  %s460_s0 = inlined_call_operand.hbm [shape: f32[8,16], index: 0, kind: input, shape index: {}]   ;;  %s461_s1 = inlined_call_operand.hbm [shape: f32[16,128], index: 1, kind: input, shape index: {}]   ;;  %s462_s2 = inlined_call_operand.vmem [shape: f32[1,128], index: 2, kind: input, shape index: {}]   ;;  %s463_s3 = inlined_call_operand.hbm [shape: f32[8,128], index: 3, kind: output, shape index: {}]  }
   0x1   :  { %9 = vsyncpa [#allocation6], 0 }
   0x2   :  { %10 = vsyncpa [#allocation4], 0  ;;  %s359_s12 = smov [#allocation2]   ;;  %s360_s14 = smov [#allocation5]  }
   0x3   :  { %s17_s13 = sshll.u32 %s359_s12, 4  ;;  %s26_s15 = sshll.u32 %s360_s14, 4  ;;  %s18_s13 = int_to_ptr.vmem [resolvable:$true] %s17_s13  ;;  %s393_s15 = int_to_ptr.vmem [resolvable:$true] %s26_s15 }
   0x4   :  { %s287_s18 = scalar_lea.hbm %s460_s0, 128 }
   0x5   :  { %p288_p0 = scmp.ne.s32.totalorder %s460_s0, %s287_s18  ;;  %p291_p1 = scmp.lt.u32.totalorder %s287_s18, %s460_s0 }
   0x7   :  { %p293_p2 = pnand %p291_p1, %p288_p0 }
   0x9   :  { %296 = shalt.err (!%p293_p2)
}
   0xa   :  { %s297_s23 = scalar_lea.vmem %s18_s13, 128  ;;  %p302_p4 = scmp.lt.s32.totalorder %s18_s13, %s18_s13 }
   0xb   :  { %p298_p3 = scmp.ne.s32.totalorder %s18_s13, %s297_s23  ;;  %p303_p5 = scmp.lt.s32.totalorder %s297_s23, %s297_s23 }
   0xd   :  { %p304_p6 = por %p303_p5, %p302_p4 }
   0xf   :  { %p305_p7 = pnand %p304_p6, %p298_p3 }
  0x11   :  { %308 = shalt.err (!%p305_p7)
}
  0x12   :  { %20 = dma.hbm_to_vmem [thread:$0]  %s460_s0, 128, %s18_s13, [#allocation3]  }
  0x13   :  { %s309_s28 = scalar_lea.hbm %s461_s1, 256 }
  0x14   :  { %p310_p8 = scmp.ne.s32.totalorder %s461_s1, %s309_s28  ;;  %p313_p9 = scmp.lt.u32.totalorder %s309_s28, %s461_s1 }
  0x16   :  { %p315_p10 = pnand %p313_p9, %p310_p8 }
  0x18   :  { %318 = shalt.err (!%p315_p10)
}
  0x19   :  { %s319_s6 = scalar_lea.vmem %s393_s15, 256  ;;  %p324_p12 = scmp.lt.s32.totalorder %s393_s15, %s393_s15 }
  0x1a   :  { %p320_p11 = scmp.ne.s32.totalorder %s393_s15, %s319_s6  ;;  %p325_p13 = scmp.lt.s32.totalorder %s319_s6, %s319_s6 }
  0x1c   :  { %p326_p0 = por %p325_p13, %p324_p12 }
  0x1e   :  { %p327_p1 = pnand %p326_p0, %p320_p11 }
  0x20   :  { %330 = shalt.err (!%p327_p1)
}
  0x21   :  { %s361_s0 = smov 128   ;;  %s362_s7 = smov 8  }
  0x22   :  { %32 = dma.hbm_to_vmem [thread:$0]  %s461_s1, 256, %s393_s15, [#allocation6], %s361_s0, %s361_s0, %s362_s7  }
  0x23   :  { %353 = dma.done.wait [#allocation3], 128  }
  0x24   :  { %354 = vsyncadd [#allocation3], 4294967168 }
  0x25   :  { %355 = dma.done.wait [#allocation6], 256  }
  0x26   :  { %356 = vsyncadd [#allocation6], 4294967040  ;;  %v363_v0 = vmov 0.0|0.0   ;;  %vm364_vm0 = vmmov 0   ;;  %v365_v1 = vmov 0.0   ;;  %v42_v2 = vld [vmem:[#allocation5] sm:$0xff] }
  0x27   :  { %262 = vmatprep.subr.bf16.mxu0 %v363_v0  ;;  %259 = vmatprep.mubr.msk.f32.mxu0 %vm364_vm0, %v365_v1  ;;  %v43_v3 = vld [vmem:[#allocation5 + $0x8] sm:$0xff]  ;;  %v41_v5 = vld [vmem:[#allocation2] sm:$0xff]  ;;  %vm51_vm1 = vcmask 130048   ;;  %v366_v20 = vmov 683565275   ;;  %s372_s1 = smov [#allocation7]  }
  0x28   :  { %v263_v4 = vpack.c.bf16 %v43_v3, %v42_v2  ;;  %v246_v6 = vld [vmem:[%s462_s2] ss:$0 sm:$0xff]  ;;  %v367_v22 = vmov 2475754826   ;;  %v368_v25 = vmov 2131351028  }
  0x29   :  { %v369_v28 = vmov 2102212464   ;;  %v370_v31 = vmov 920167782   ;;  %v371_v34 = vmov 1326507024  }
  0x2a   :  { %264 = vmatpush3.bf16.msra.mxu0 %v263_v4  ;;  %s236_s2 = sshll.u32 %s372_s1, 4  ;;  %s237_s2 = int_to_ptr.vmem [resolvable:$true] %s236_s2 }
  0x2b   :  { %s331_s12 = scalar_lea.vmem %s237_s2, 128  ;;  %p336_p3 = scmp.lt.s32.totalorder %s237_s2, %s237_s2 }
  0x2c   :  { %p332_p2 = scmp.ne.s32.totalorder %s237_s2, %s331_s12  ;;  %p337_p4 = scmp.lt.s32.totalorder %s331_s12, %s331_s12 }
  0x2d   :  { %260 = vmatmul.mubr.msk.f32.vlgmr.msra.gmra.mrb[0].mxu0 %vm51_vm1, %v41_v5 }
  0x2e   :  { %p338_p5 = por %p337_p4, %p336_p3 }
  0x30   :  { %p339_p6 = pnand %p338_p5, %p332_p2 }
 0x100   :  { %v121_v7 = vpop.f32.mrb[0].mxu0 }
 0x101   :  { %v427_v8 = vadd.f32 %v246_v6, %v121_v7  ;;  %v261_v9 = vpop.f32.mrb[1].mxu0 }
 0x103   :  { %v128_v10 = vand.u32 2139095040, %v427_v8  ;;  %v125_v14 = vand.u32 2147483647, %v427_v8  ;;  %vm127_vm9 = vcmp.lt.s32.totalorder %v427_v8, 0  ;;  %vm217_vm14 = vweird.f32 %v427_v8 }
 0x105   :  { %v129_v11 = vshrl.u32 %v128_v10, 23  ;;  %v132_v17 = vand.u32 8388607, %v125_v14  ;;  %vm126_vm10 = vcmp.le.f32.partialorder %v125_v14, 0.7853982 }
 0x107   :  { %v248_v12 = vadd.s32 4294967169, %v129_v11  ;;  %v133_v36 = vor.u32 8388608, %v132_v17 }
 0x109   :  { %v135_v13 = vadd.s32 1, %v248_v12  ;;  %v173_v50 = vshll.u32 %v133_v36, 8 }
 0x10b   :  { %vm136_vm2 = vcmp.gt.s32.totalorder %v135_v13, 0 }
 0x10c   :  { %v137_v15 = vsel %vm136_vm2, %v135_v13, 0 }
 0x10d   :  { %v139_v16 = vand.u32 31, %v137_v15  ;;  %v138_v19 = vshrl.u32 %v137_v15, 5 }
 0x10f   :  { %v140_v18 = vsub.s32 32, %v139_v16  ;;  %v142_v21 = vshll.u32 %v366_v20, %v139_v16  ;;  %v145_v23 = vshll.u32 %v367_v22, %v139_v16  ;;  %v148_v27 = vshll.u32 %v368_v25, %v139_v16 }
 0x110   :  { %v151_v30 = vshll.u32 %v369_v28, %v139_v16  ;;  %v154_v33 = vshll.u32 %v370_v31, %v139_v16  ;;  %vm157_vm3 = vcmp.lt.s32.totalorder %v138_v19, 1  ;;  %vm160_vm4 = vcmp.lt.s32.totalorder %v138_v19, 4 }
 0x111   :  { %v143_v24 = vshrl.u32 %v367_v22, %v140_v18  ;;  %v146_v26 = vshrl.u32 %v368_v25, %v140_v18  ;;  %v149_v29 = vshrl.u32 %v369_v28, %v140_v18  ;;  %v152_v32 = vshrl.u32 %v370_v31, %v140_v18 }
 0x112   :  { %v155_v35 = vshrl.u32 %v371_v34, %v140_v18  ;;  %v141_v45 = vshrl.u32 %v366_v20, %v140_v18  ;;  %vm159_vm5 = vcmp.lt.s32.totalorder %v138_v19, 3  ;;  %vm158_vm6 = vcmp.lt.s32.totalorder %v138_v19, 2 }
 0x113   :  { %v144_v37 = vor.u32 %v143_v24, %v142_v21  ;;  %v147_v38 = vor.u32 %v146_v26, %v145_v23  ;;  %v150_v39 = vor.u32 %v149_v29, %v148_v27  ;;  %v153_v40 = vor.u32 %v152_v32, %v151_v30 }
 0x114   :  { %v156_v41 = vor.u32 %v155_v35, %v154_v33 }
 0x115   :  { %v162_v42 = vsel %vm160_vm4, %v150_v39, 2102212464  ;;  %v165_v43 = vsel %vm157_vm3, %v144_v37, %v147_v38  ;;  %v169_v44 = vsel %vm157_vm3, %v147_v38, %v150_v39  ;;  %v166_v46 = vsel %vm160_vm4, %v153_v40, 920167782 }
 0x116   :  { %v170_v47 = vsel %vm160_vm4, %v156_v41, 1326507024  ;;  %v167_v48 = vsel %vm159_vm5, %v150_v39, %v166_v46  ;;  %v161_v51 = vsel %vm157_vm3, %v141_v45, %v144_v37  ;;  %v163_v52 = vsel %vm159_vm5, %v147_v38, %v162_v42 }
 0x117   :  { %v171_v49 = vsel %vm159_vm5, %v153_v40, %v170_v47  ;;  %v168_v53 = vsel %vm158_vm6, %v165_v43, %v167_v48  ;;  %v164_v59 = vsel %vm158_vm6, %v161_v51, %v163_v52 }
 0x118   :  { %v172_v54 = vsel %vm158_vm6, %v169_v44, %v171_v49  ;;  %v436_v57 = vmul.u32.u64.low %v173_v50, %v168_v53  ;;  %v437_v58 = vmul.u32.u64.high %v173_v50, %v168_v53, %v436_v57  ;;  %v180_v61 = vmul.u32 %v173_v50, %v164_v59 }
 0x119   :  { %v433_v55 = vmul.u32.u64.low %v173_v50, %v172_v54  ;;  %v434_v56 = vmul.u32.u64.high %v173_v50, %v172_v54, %v433_v55 }
 0x11a   :  { %v183_v60 = vadd.s32 1, %v437_v58 }
 0x11b   :  { %vm182_vm7 = vc.u32 %v434_v56, %v436_v57  ;;  %v181_v10 = vadd.s32 %v436_v57, %v434_v56 }
 0x11c   :  { %v184_v62 = vsel %vm182_vm7, %v183_v60, %v437_v58 }
 0x11d   :  { %v185_v63 = vadd.s32 %v184_v62, %v180_v61 }
 0x11f   :  { %v186_v0 = vadd.s32 536870912, %v185_v63 }
 0x121   :  { %v187_v1 = vshrl.u32 %v186_v0, 30 }
 0x123   :  { %v188_v2 = vshll.u32 %v187_v1, 30  ;;  %v211_v23 = vsub.s32 4, %v187_v1 }
 0x125   :  { %v189_v3 = vsub.s32 %v185_v63, %v188_v2  ;;  %v212_v26 = vsel %vm127_vm9, %v211_v23, %v187_v1 }
 0x126   :  { %v214_v28 = vsel %vm126_vm10, 0, %v212_v26 }
 0x127   :  { %v191_v4 = vsub.s32 0, %v189_v3  ;;  %v218_v29 = vadd.s32 3, %v214_v28 }
 0x129   :  { %v249_v5 = vmin.u32 %v191_v4, %v189_v3  ;;  %v219_v30 = vand.u32 3, %v218_v29 }
 0x12b   :  { %v193_v6 = vclz %v249_v5  ;;  %vm224_vm11 = vcmp.eq.s32.totalorder %v219_v30, 2  ;;  %vm221_vm12 = vcmp.eq.s32.totalorder %v219_v30, 0  ;;  %vm220_vm13 = vcmp.lt.s32.totalorder %v219_v30, 2 }
 0x12d   :  { %v250_v7 = vadd.s32 4294967294, %v193_v6 }
 0x12f   :  { %vm251_vm8 = vcmp.lt.s32.totalorder %v250_v7, 0 }
 0x130   :  { %v196_v9 = vsel %vm251_vm8, 0, %v250_v7 }
 0x131   :  { %v197_v11 = vsub.s32 32, %v196_v9  ;;  %v201_v12 = vsub.s32 4294967266, %v196_v9  ;;  %v198_v13 = vshll.u32 %v189_v3, %v196_v9 }
 0x133   :  { %v199_v15 = vshrl.u32 %v181_v10, %v197_v11  ;;  %v202_v16 = vadd.s32 127, %v201_v12 }
 0x135   :  { %v200_v17 = vor.u32 %v199_v15, %v198_v13  ;;  %v203_v18 = vshll.u32 %v202_v16, 23 }
 0x137   :  { %v204_v19 = vor.u32 4788187, %v203_v18  ;;  %v207_v21 = vcvt.s32.f32 %v200_v17 }
 0x139   :  { %v205_v20 = vand.u32 2147483647, %v204_v19 }
 0x13b   :  { %v208_v22 = vmul.f32 %v207_v21, %v205_v20 }
 0x13d   :  { %v209_v24 = vxor.u32 2147483648, %v208_v22 }
 0x13f   :  { %v210_v25 = vsel %vm127_vm9, %v209_v24, %v208_v22 }
 0x140   :  { %v213_v27 = vsel %vm126_vm10, %v427_v8, %v210_v25 }
 0x141   :  { %283 = vcosq.f32 %v213_v27 }
 0x142   :  { %285 = vsinq.f32 %v213_v27 }
 0x14b   :  { %v284_v31 = vpop.eup %283 }
 0x14c   :  { %v286_v32 = vpop.eup %285  ;;  %v225_v33 = vxor.u32 2147483648, %v284_v31 }
 0x14d   :  { %v222_v34 = vxor.u32 2147483648, %v286_v32 }
 0x14e   :  { %v226_v35 = vsel %vm224_vm11, %v225_v33, %v286_v32 }
 0x14f   :  { %v223_v36 = vsel %vm221_vm12, %v284_v31, %v222_v34 }
 0x150   :  { %v227_v14 = vsel %vm220_vm13, %v223_v36, %v226_v35 }
 0x151   :  { %v228_v37 = vsel %vm217_vm14, nan, %v227_v14 }
 0x152   :  { %229 = vst [vmem:[#allocation7] sm:$0xff] %v228_v37 }
 0x153   :  { %342 = shalt.err (!%p339_p6)
}
 0x154   :  { %s343_s15 = scalar_lea.hbm %s463_s3, 128 }
 0x155   :  { %p344_p7 = scmp.ne.s32.totalorder %s463_s3, %s343_s15  ;;  %p347_p8 = scmp.lt.u32.totalorder %s343_s15, %s463_s3 }
 0x157   :  { %p349_p9 = pnand %p347_p8, %p344_p7 }
 0x159   :  { %352 = shalt.err (!%p349_p9)
}
 0x15a   :  { %239 = dma.vmem_to_hbm [thread:$0]  %s237_s2, 128, %s463_s3, [#allocation4]  }
 0x15b   :  { %357 = dma.done.wait [#allocation4], 128  }
 0x15c   :  { %358 = vsyncadd [#allocation4], 4294967168 }
 0x15d   :  { %243 = vsyncpa [#allocation3], 1 }
 0x15e   :  { %244 = vsyncpa [#allocation6], 1 }
 0x15f   :  { %245 = vsyncpa [#allocation4], 1 }

</bundles_post_ra>
